<compile_context>
chip_gen: v6e
topology: v6e:2x2x1
jax: 0.10.0
libtpu: 0.0.40
codegen_flags: <defaults>
</compile_context>

<pallas_src>
import numpy as np
import jax
import jax.numpy as jnp
from jax.experimental import pallas as pl
from jax.experimental.pallas import tpu as pltpu

SCALES = (1, 2, 3, 6)
K2 = sum(k * k for k in SCALES)   # 50 pooled columns across all pyramid scales


# ---------------------------------------------------------------------------
# Static matrices reproducing PyTorch AdaptiveAvgPool2d / bilinear align_corners
# ---------------------------------------------------------------------------
def _adaptive_pool_matrix(k, size):
    """R[i, y] = 1/|bin_i| if y in bin_i (PyTorch adaptive pooling bins)."""
    R = np.zeros((k, size), dtype=np.float64)
    for i in range(k):
        s = (i * size) // k
        e = -((-(i + 1) * size) // k)  # ceil((i+1)*size/k)
        R[i, s:e] = 1.0 / (e - s)
    return R


def _bilinear_matrix(out_size, in_size):
    """A[o, i] = 1-D bilinear weight, F.interpolate(mode='bilinear', align_corners=True)."""
    A = np.zeros((out_size, in_size), dtype=np.float64)
    for o in range(out_size):
        src = 0.0 if (in_size == 1 or out_size == 1) else o * (in_size - 1) / (out_size - 1)
        i0 = min(int(np.floor(src)), in_size - 1)
        i1 = min(i0 + 1, in_size - 1)
        f = src - i0
        A[o, i0] += 1.0 - f
        A[o, i1] += f
    return A


# ---------------------------------------------------------------------------
# Per-generation hardware queries (safe fallbacks if the query is unavailable)
# ---------------------------------------------------------------------------
def _vmem_capacity_bytes():
    try:
        return int(pltpu.get_tpu_info().vmem_capacity_bytes)
    except Exception:
        return 64 << 20            # conservative: v7x has the smallest VMEM


def _tensorcores_per_chip():
    try:
        kind = jax.devices()[0].device_kind.lower()
    except Exception:
        kind = ""
    return 2 if "v7" in kind else 1   # v7x: 2 TCs/chip; v5e/v6e: 1


# ---------------------------------------------------------------------------
# Pallas PyramidPooling
# ---------------------------------------------------------------------------
def make_pyramid_pooling(in_channels, path_num, pid, H, W, key,
                         compute_dtype=jnp.float32):
    C = in_channels
    assert C % (path_num * 4) == 0
    OC = C // 4                       # conv1x1 out channels
    cs = C // (path_num * 4)          # per-feat channel slice width
    xs = C // path_num                # passthrough x channel slice width
    fc = 4 * cs                       # total feat channels written
    HW = H * W
    out_c = xs + fc
    x_lo, x_hi = pid * xs, (pid + 1) * xs
    eps = 1e-5
    esz = np.dtype(compute_dtype).itemsize

    # Deterministic synthetic parameters (Conv2d kaiming-ish; BN gamma/beta).
    keys = jax.random.split(key, 3 * len(SCALES))
    params = []
    for idx in range(len(SCALES)):
        w = jax.random.normal(keys[3 * idx], (OC, C), jnp.float32) / np.sqrt(C)
        gamma = 1.0 + 0.1 * jax.random.normal(keys[3 * idx + 1], (OC,), jnp.float32)
        beta = 0.1 * jax.random.normal(keys[3 * idx + 2], (OC,), jnp.float32)
        params.append((np.asarray(w), np.asarray(gamma), np.asarray(beta)))

    # Fused constant operators.
    pm_blocks, u_blocks, w_rows, beta_rows = [], [], [], []
    for k, (w, gamma, beta) in zip(SCALES, params):
        pm_blocks.append(np.kron(_adaptive_pool_matrix(k, H),
                                 _adaptive_pool_matrix(k, W)).T)          # (HW, k*k)
        u_blocks.append(np.kron(_bilinear_matrix(H, k),
                                _bilinear_matrix(W, k)).T)                # (k*k, HW)
        scale = gamma.astype(np.float64) / np.sqrt(1.0 + eps)             # BN eval fold
        w_rows.append((scale[:, None] * w)[pid * cs:(pid + 1) * cs, :])   # (cs, C)
        beta_rows.append(beta.astype(np.float64)[pid * cs:(pid + 1) * cs])

    pm_all = np.concatenate(pm_blocks, axis=1)        # (HW, K2)
    u_all = np.concatenate(u_blocks, axis=0)          # (K2, HW)
    w_all = np.concatenate(w_rows, axis=0)            # (fc, C)
    beta_all = np.concatenate(beta_rows, axis=0)      # (fc,)

    # Block-diagonal scale mask (zeros cross-scale products of the fused conv
    # matmul) packed with beta into a single small constant operand: (fc, K2+1).
    mask = np.zeros((fc, K2), dtype=np.float64)
    col = 0
    for i, k in enumerate(SCALES):
        mask[i * cs:(i + 1) * cs, col:col + k * k] = 1.0
        col += k * k
    bm = np.concatenate([mask, beta_all[:, None]], axis=1)

    pm_c = jnp.asarray(pm_all, jnp.float32).astype(compute_dtype)
    u_c = jnp.asarray(u_all, jnp.float32).astype(compute_dtype)
    w_c = jnp.asarray(w_all, jnp.float32).astype(compute_dtype)
    bm_j = jnp.asarray(bm, jnp.float32)               # beta/mask stay f32
    const_bytes = int(pm_c.size + u_c.size + w_c.size) * esz + int(bm_j.size) * 4

    def forward(x_nchw):
        N = x_nchw.shape[0]
        n_tc = _tensorcores_per_chip()
        vmem_cap = _vmem_capacity_bytes()

        # Batch-block size: fold the batch into one grid step on single-TC chips
        # (amortizes per-step overhead), keep >= n_tc parallel steps on v7x, and
        # stay well inside the double-buffered VMEM budget.
        def blocks_bytes(nb):
            return nb * (C + out_c) * HW * esz

        n_blk = max(1, -(-N // n_tc))
        while n_blk > 1 and (2 * blocks_bytes(n_blk) + const_bytes + (4 << 20)
                             ) > int(0.6 * vmem_cap):
            n_blk = max(1, n_blk // 2)
        steps = -(-N // n_blk)
        Np = steps * n_blk

        x_flat = x_nchw.reshape(N, C, HW).astype(compute_dtype)
        if Np > N:
            x_flat = jnp.concatenate(
                [x_flat, jnp.zeros((Np - N, C, HW), compute_dtype)], axis=0)

        def kernel(x_ref, pm_ref, w_ref, bm_ref, u_ref, out_ref, copy_sem):
            # Passthrough channel slice on the DMA engine (VMEM->VMEM): started
            # first so it overlaps the MXU matmuls, waited at the very end.
            copies = [pltpu.make_async_copy(x_ref.at[b, x_lo:x_hi, :],
                                            out_ref.at[b, 0:xs, :],
                                            copy_sem.at[b])
                      for b in range(n_blk)]
            for cp in copies:
                cp.start()

            # Adaptive pooling of the whole batch block as ONE matmul (bigger M).
            x2d = x_ref[...].reshape(n_blk * C, HW)
            pooled = jnp.dot(x2d, pm_ref[...],
                             preferred_element_type=jnp.float32)      # (n_blk*C, K2)

            # BN-folded 1x1 conv + beta + ReLU + block-diagonal mask, per batch.
            w32 = w_ref[...].astype(jnp.float32)
            bmv = bm_ref[...]
            beta_col = bmv[:, K2:K2 + 1]
            mask_blk = bmv[:, 0:K2]
            conv_rows = []
            for b in range(n_blk):
                cb = jnp.dot(w32, pooled[b * C:(b + 1) * C, :],
                             preferred_element_type=jnp.float32)      # (fc, K2)
                conv_rows.append(jnp.maximum(cb + beta_col, 0.0) * mask_blk)
            conv = conv_rows[0] if n_blk == 1 else jnp.concatenate(conv_rows, axis=0)

            # Bilinear upsample of all scales / all batch rows in one matmul.
            feat = jnp.dot(conv.astype(u_ref.dtype), u_ref[...],
                           preferred_element_type=jnp.float32)        # (n_blk*fc, HW)
            out_ref[:, xs:out_c, :] = feat.reshape(n_blk, fc, HW).astype(out_ref.dtype)

            for cp in copies:
                cp.wait()

        # VMEM budget: double-buffered x/out blocks + single-buffered constants
        # + f32 feat intermediate + headroom; cap per generation.
        vmem_need = (2 * blocks_bytes(n_blk) + const_bytes
                     + n_blk * fc * HW * 4 + (4 << 20))
        vmem_limit = int(min(vmem_need, int(0.75 * vmem_cap)))

        flops = int(Np) * 2 * (C * HW * K2 + fc * C * K2 + fc * K2 * HW)
        cost = pl.CostEstimate(
            flops=flops, transcendentals=0,
            bytes_accessed=int(Np) * (C + out_c) * HW * esz + const_bytes)

        out = pl.pallas_call(
            kernel,
            out_shape=jax.ShapeDtypeStruct((Np, out_c, HW), compute_dtype),
            grid_spec=pltpu.PrefetchScalarGridSpec(
                num_scalar_prefetch=0,
                grid=(steps,),
                in_specs=[
                    pl.BlockSpec((n_blk, C, HW), lambda s: (s, 0, 0)),
                    # Grid-invariant constants: single-buffered.
                    pl.BlockSpec(pm_c.shape, lambda s: (0, 0),
                                 pipeline_mode=pl.Buffered(1)),
                    pl.BlockSpec(w_c.shape, lambda s: (0, 0),
                                 pipeline_mode=pl.Buffered(1)),
                    pl.BlockSpec(bm_j.shape, lambda s: (0, 0),
                                 pipeline_mode=pl.Buffered(1)),
                    pl.BlockSpec(u_c.shape, lambda s: (0, 0),
                                 pipeline_mode=pl.Buffered(1)),
                ],
                out_specs=pl.BlockSpec((n_blk, out_c, HW), lambda s: (s, 0, 0)),
                scratch_shapes=[pltpu.SemaphoreType.DMA((n_blk,))],
            ),
            compiler_params=pltpu.CompilerParams(
                dimension_semantics=("parallel",),
                vmem_limit_bytes=vmem_limit),
            cost_estimate=cost,
        )(x_flat, pm_c, w_c, bm_j, u_c)
        return out[:N].reshape(N, out_c, H, W)

    return forward, params, eps


# ---------------------------------------------------------------------------
# Independent numpy reference (PyTorch semantics), for validation.
# ---------------------------------------------------------------------------
def reference(x, params, pid, path_num, eps):
    x = np.asarray(x, np.float64)
    N, C, H, W = x.shape
    cs = C // (path_num * 4)
    outs = [x[:, pid * C // path_num:(pid + 1) * C // path_num]]
    for k, (w, gamma, beta) in zip(SCALES, params):
        pooled = np.zeros((N, C, k, k))
        for i in range(k):
            y0, y1 = (i * H) // k, -((-(i + 1) * H) // k)
            for j in range(k):
                x0, x1 = (j * W) // k, -((-(j + 1) * W) // k)
                pooled[:, :, i, j] = x[:, :, y0:y1, x0:x1].mean(axis=(2, 3))
        conv = np.einsum('oc,ncij->noij', np.asarray(w, np.float64), pooled)
        scale = np.asarray(gamma, np.float64) / np.sqrt(1.0 + eps)
        conv = conv * scale[None, :, None, None] + np.asarray(beta, np.float64)[None, :, None, None]
        conv = np.maximum(conv, 0.0)
        up = np.zeros((N, conv.shape[1], H, W))
        for y in range(H):
            sy = y * (k - 1) / (H - 1) if k > 1 else 0.0
            i0 = min(int(np.floor(sy)), k - 1)
            i1 = min(i0 + 1, k - 1)
            fy = sy - i0
            for xx in range(W):
                sx = xx * (k - 1) / (W - 1) if k > 1 else 0.0
                j0 = min(int(np.floor(sx)), k - 1)
                j1 = min(j0 + 1, k - 1)
                fx = sx - j0
                up[:, :, y, xx] = ((1 - fy) * (1 - fx) * conv[:, :, i0, j0]
                                   + (1 - fy) * fx * conv[:, :, i0, j1]
                                   + fy * (1 - fx) * conv[:, :, i1, j0]
                                   + fy * fx * conv[:, :, i1, j1])
        outs.append(up[:, pid * cs:(pid + 1) * cs])
    return np.concatenate(outs, axis=1)


if __name__ == "__main__":
    # C=64 chosen so the pid channel slices (xs=32, cs=8) are sublane(8)-aligned.
    N, C, H, W = 2, 64, 16, 16
    path_num, pid = 2, 1

    key = jax.random.PRNGKey(0)
    kx, kp = jax.random.split(key)
    x = jax.random.normal(kx, (N, C, H, W), jnp.float32)

    forward, params, eps = make_pyramid_pooling(C, path_num, pid, H, W, kp)
    out = jax.block_until_ready(forward(x))

    ref = reference(np.asarray(x), params, pid, path_num, eps)
    np.testing.assert_allclose(np.asarray(out), ref, rtol=1e-4, atol=1e-4)
    print("KERNEL_OK")
</pallas_src>

<mosaic_0001>
module attributes {stable_mosaic.version = 11 : i64} {
  func.func @kernel(%arg0: i32, %arg1: memref<2x64x256xf32, #tpu.memory_space<vmem>>, %arg2: memref<256x50xf32, #tpu.memory_space<vmem>>, %arg3: memref<32x64xf32, #tpu.memory_space<vmem>>, %arg4: memref<32x51xf32, #tpu.memory_space<vmem>>, %arg5: memref<50x256xf32, #tpu.memory_space<vmem>>, %arg6: memref<2x64x256xf32, #tpu.memory_space<vmem>>, %arg7: memref<2x!tpu.dma_semaphore, #tpu.memory_space<semaphore_mem>>) attributes {dimension_semantics = [#tpu.dimension_semantics<parallel>], iteration_bounds = array<i64: 1>, scalar_prefetch = 0 : i64, scratch_operands = 1 : i64, tpu.core_type = #tpu.core_type<tc>, window_params = [{transform_indices = @transform_0, window_bounds = array<i64: 2, 64, 256>}, {pipeline_mode = #tpu.pipeline_mode<synchronous>, transform_indices = @transform_1, window_bounds = array<i64: 256, 50>}, {pipeline_mode = #tpu.pipeline_mode<synchronous>, transform_indices = @transform_2, window_bounds = array<i64: 32, 64>}, {pipeline_mode = #tpu.pipeline_mode<synchronous>, transform_indices = @transform_3, window_bounds = array<i64: 32, 51>}, {pipeline_mode = #tpu.pipeline_mode<synchronous>, transform_indices = @transform_4, window_bounds = array<i64: 50, 256>}, {transform_indices = @transform_5, window_bounds = array<i64: 2, 64, 256>}]} {
    %c0_i32 = arith.constant 0 : i32
    %c0_i32_0 = arith.constant 0 : i32
    %c0_i32_1 = arith.constant 0 : i32
    %c32_i32 = arith.constant 32 : i32
    %c0_i32_2 = arith.constant 0 : i32
    %0 = tpu.memref_slice %arg1[%c0_i32, %c32_i32, %c0_i32_2] : memref<2x64x256xf32, #tpu.memory_space<vmem>> -> memref<1x32x256xf32, #tpu.memory_space<vmem>>
    %1 = tpu.memref_squeeze %0 : memref<1x32x256xf32, #tpu.memory_space<vmem>> -> memref<32x256xf32, #tpu.memory_space<vmem>>
    %c0_i32_3 = arith.constant 0 : i32
    %c0_i32_4 = arith.constant 0 : i32
    %2 = tpu.memref_slice %arg6[%c0_i32_0, %c0_i32_3, %c0_i32_4] : memref<2x64x256xf32, #tpu.memory_space<vmem>> -> memref<1x32x256xf32, #tpu.memory_space<vmem>>
    %3 = tpu.memref_squeeze %2 : memref<1x32x256xf32, #tpu.memory_space<vmem>> -> memref<32x256xf32, #tpu.memory_space<vmem>>
    %4 = tpu.memref_slice %arg7[%c0_i32_1] : memref<2x!tpu.dma_semaphore, #tpu.memory_space<semaphore_mem>> -> memref<1x!tpu.dma_semaphore, #tpu.memory_space<semaphore_mem>>
    %5 = tpu.memref_squeeze %4 : memref<1x!tpu.dma_semaphore, #tpu.memory_space<semaphore_mem>> -> memref<!tpu.dma_semaphore, #tpu.memory_space<semaphore_mem>>
    tpu.enqueue_dma source(%1 : memref<32x256xf32, #tpu.memory_space<vmem>>) target(%3 : memref<32x256xf32, #tpu.memory_space<vmem>>) target_semaphore(%5 : memref<!tpu.dma_semaphore, #tpu.memory_space<semaphore_mem>>)
    %c1_i32 = arith.constant 1 : i32
    %c1_i32_5 = arith.constant 1 : i32
    %c1_i32_6 = arith.constant 1 : i32
    %c32_i32_7 = arith.constant 32 : i32
    %c0_i32_8 = arith.constant 0 : i32
    %6 = tpu.memref_slice %arg1[%c1_i32, %c32_i32_7, %c0_i32_8] : memref<2x64x256xf32, #tpu.memory_space<vmem>> -> memref<1x32x256xf32, #tpu.memory_space<vmem>>
    %7 = tpu.memref_squeeze %6 : memref<1x32x256xf32, #tpu.memory_space<vmem>> -> memref<32x256xf32, #tpu.memory_space<vmem>>
    %c0_i32_9 = arith.constant 0 : i32
    %c0_i32_10 = arith.constant 0 : i32
    %8 = tpu.memref_slice %arg6[%c1_i32_5, %c0_i32_9, %c0_i32_10] : memref<2x64x256xf32, #tpu.memory_space<vmem>> -> memref<1x32x256xf32, #tpu.memory_space<vmem>>
    %9 = tpu.memref_squeeze %8 : memref<1x32x256xf32, #tpu.memory_space<vmem>> -> memref<32x256xf32, #tpu.memory_space<vmem>>
    %10 = tpu.memref_slice %arg7[%c1_i32_6] : memref<2x!tpu.dma_semaphore, #tpu.memory_space<semaphore_mem>> -> memref<1x!tpu.dma_semaphore, #tpu.memory_space<semaphore_mem>>
    %11 = tpu.memref_squeeze %10 : memref<1x!tpu.dma_semaphore, #tpu.memory_space<semaphore_mem>> -> memref<!tpu.dma_semaphore, #tpu.memory_space<semaphore_mem>>
    tpu.enqueue_dma source(%7 : memref<32x256xf32, #tpu.memory_space<vmem>>) target(%9 : memref<32x256xf32, #tpu.memory_space<vmem>>) target_semaphore(%11 : memref<!tpu.dma_semaphore, #tpu.memory_space<semaphore_mem>>)
    %c0 = arith.constant 0 : index
    %c0_11 = arith.constant 0 : index
    %c0_12 = arith.constant 0 : index
    %12 = vector.load %arg1[%c0, %c0_11, %c0_12] : memref<2x64x256xf32, #tpu.memory_space<vmem>>, vector<2x64x256xf32>
    %13 = vector.shape_cast %12 : vector<2x64x256xf32> to vector<128x256xf32>
    %c0_13 = arith.constant 0 : index
    %c0_14 = arith.constant 0 : index
    %14 = vector.load %arg2[%c0_13, %c0_14] : memref<256x50xf32, #tpu.memory_space<vmem>>, vector<256x50xf32>
    %cst = arith.constant dense<0.000000e+00> : vector<128x50xf32>
    %15 = tpu.matmul %13, %14, %cst {dimension_numbers = #tpu.dot_dimension_numbers<[1], [0], [0], [1], [0, 0, 1, 1], [], []>} : vector<128x256xf32>, vector<256x50xf32>, vector<128x50xf32> -> vector<128x50xf32>
    %c0_15 = arith.constant 0 : index
    %c0_16 = arith.constant 0 : index
    %16 = vector.load %arg3[%c0_15, %c0_16] : memref<32x64xf32, #tpu.memory_space<vmem>>, vector<32x64xf32>
    %c0_17 = arith.constant 0 : index
    %c0_18 = arith.constant 0 : index
    %17 = vector.load %arg4[%c0_17, %c0_18] : memref<32x51xf32, #tpu.memory_space<vmem>>, vector<32x51xf32>
    %18 = vector.extract_strided_slice %17 {offsets = [0, 50], sizes = [32, 1], strides = [1, 1]} : vector<32x51xf32> to vector<32x1xf32>
    %19 = vector.extract_strided_slice %17 {offsets = [0, 0], sizes = [32, 50], strides = [1, 1]} : vector<32x51xf32> to vector<32x50xf32>
    %20 = vector.extract_strided_slice %15 {offsets = [0, 0], sizes = [64, 50], strides = [1, 1]} : vector<128x50xf32> to vector<64x50xf32>
    %cst_19 = arith.constant dense<0.000000e+00> : vector<32x50xf32>
    %21 = tpu.matmul %16, %20, %cst_19 {dimension_numbers = #tpu.dot_dimension_numbers<[1], [0], [0], [1], [0, 0, 1, 1], [], []>} : vector<32x64xf32>, vector<64x50xf32>, vector<32x50xf32> -> vector<32x50xf32>
    %22 = vector.broadcast %18 : vector<32x1xf32> to vector<32x50xf32>
    %23 = arith.addf %21, %22 : vector<32x50xf32>
    %cst_20 = arith.constant 0.000000e+00 : f32
    %24 = vector.broadcast %cst_20 : f32 to vector<32x50xf32>
    %25 = arith.maximumf %23, %24 : vector<32x50xf32>
    %26 = arith.mulf %25, %19 : vector<32x50xf32>
    %27 = vector.extract_strided_slice %15 {offsets = [64, 0], sizes = [64, 50], strides = [1, 1]} : vector<128x50xf32> to vector<64x50xf32>
    %cst_21 = arith.constant dense<0.000000e+00> : vector<32x50xf32>
    %28 = tpu.matmul %16, %27, %cst_21 {dimension_numbers = #tpu.dot_dimension_numbers<[1], [0], [0], [1], [0, 0, 1, 1], [], []>} : vector<32x64xf32>, vector<64x50xf32>, vector<32x50xf32> -> vector<32x50xf32>
    %29 = vector.broadcast %18 : vector<32x1xf32> to vector<32x50xf32>
    %30 = arith.addf %28, %29 : vector<32x50xf32>
    %cst_22 = arith.constant 0.000000e+00 : f32
    %31 = vector.broadcast %cst_22 : f32 to vector<32x50xf32>
    %32 = arith.maximumf %30, %31 : vector<32x50xf32>
    %33 = arith.mulf %32, %19 : vector<32x50xf32>
    %34 = tpu.concatenate %26, %33 in 0 : vector<32x50xf32>, vector<32x50xf32> -> vector<64x50xf32>
    %c0_23 = arith.constant 0 : index
    %c0_24 = arith.constant 0 : index
    %35 = vector.load %arg5[%c0_23, %c0_24] : memref<50x256xf32, #tpu.memory_space<vmem>>, vector<50x256xf32>
    %cst_25 = arith.constant dense<0.000000e+00> : vector<64x256xf32>
    %36 = tpu.matmul %34, %35, %cst_25 {dimension_numbers = #tpu.dot_dimension_numbers<[1], [0], [0], [1], [0, 0, 1, 1], [], []>} : vector<64x50xf32>, vector<50x256xf32>, vector<64x256xf32> -> vector<64x256xf32>
    %37 = vector.shape_cast %36 : vector<64x256xf32> to vector<2x32x256xf32>
    %c0_26 = arith.constant 0 : index
    %c32 = arith.constant 32 : index
    %c0_27 = arith.constant 0 : index
    %38 = vector.load %arg6[%c0_26, %c32, %c0_27] : memref<2x64x256xf32, #tpu.memory_space<vmem>>, vector<2x32x256xf32>
    tpu.vector_store %arg6[%c0_26, %c32, %c0_27], %37 {strides = array<i32>} : memref<2x64x256xf32, #tpu.memory_space<vmem>>, vector<2x32x256xf32>,
    %c0_i32_28 = arith.constant 0 : i32
    %c0_i32_29 = arith.constant 0 : i32
    %c0_i32_30 = arith.constant 0 : i32
    %c32_i32_31 = arith.constant 32 : i32
    %c0_i32_32 = arith.constant 0 : i32
    %39 = tpu.memref_slice %arg1[%c0_i32_28, %c32_i32_31, %c0_i32_32] : memref<2x64x256xf32, #tpu.memory_space<vmem>> -> memref<1x32x256xf32, #tpu.memory_space<vmem>>
    %40 = tpu.memref_squeeze %39 : memref<1x32x256xf32, #tpu.memory_space<vmem>> -> memref<32x256xf32, #tpu.memory_space<vmem>>
    %c0_i32_33 = arith.constant 0 : i32
    %c0_i32_34 = arith.constant 0 : i32
    %41 = tpu.memref_slice %arg6[%c0_i32_29, %c0_i32_33, %c0_i32_34] : memref<2x64x256xf32, #tpu.memory_space<vmem>> -> memref<1x32x256xf32, #tpu.memory_space<vmem>>
    %42 = tpu.memref_squeeze %41 : memref<1x32x256xf32, #tpu.memory_space<vmem>> -> memref<32x256xf32, #tpu.memory_space<vmem>>
    %43 = tpu.memref_slice %arg7[%c0_i32_30] : memref<2x!tpu.dma_semaphore, #tpu.memory_space<semaphore_mem>> -> memref<1x!tpu.dma_semaphore, #tpu.memory_space<semaphore_mem>>
    %44 = tpu.memref_squeeze %43 : memref<1x!tpu.dma_semaphore, #tpu.memory_space<semaphore_mem>> -> memref<!tpu.dma_semaphore, #tpu.memory_space<semaphore_mem>>
    tpu.wait_dma2 semaphore(%44 : memref<!tpu.dma_semaphore, #tpu.memory_space<semaphore_mem>>) src(%40 : memref<32x256xf32, #tpu.memory_space<vmem>>) dst(%42 : memref<32x256xf32, #tpu.memory_space<vmem>>)
    %c1_i32_35 = arith.constant 1 : i32
    %c1_i32_36 = arith.constant 1 : i32
    %c1_i32_37 = arith.constant 1 : i32
    %c32_i32_38 = arith.constant 32 : i32
    %c0_i32_39 = arith.constant 0 : i32
    %45 = tpu.memref_slice %arg1[%c1_i32_35, %c32_i32_38, %c0_i32_39] : memref<2x64x256xf32, #tpu.memory_space<vmem>> -> memref<1x32x256xf32, #tpu.memory_space<vmem>>
    %46 = tpu.memref_squeeze %45 : memref<1x32x256xf32, #tpu.memory_space<vmem>> -> memref<32x256xf32, #tpu.memory_space<vmem>>
    %c0_i32_40 = arith.constant 0 : i32
    %c0_i32_41 = arith.constant 0 : i32
    %47 = tpu.memref_slice %arg6[%c1_i32_36, %c0_i32_40, %c0_i32_41] : memref<2x64x256xf32, #tpu.memory_space<vmem>> -> memref<1x32x256xf32, #tpu.memory_space<vmem>>
    %48 = tpu.memref_squeeze %47 : memref<1x32x256xf32, #tpu.memory_space<vmem>> -> memref<32x256xf32, #tpu.memory_space<vmem>>
    %49 = tpu.memref_slice %arg7[%c1_i32_37] : memref<2x!tpu.dma_semaphore, #tpu.memory_space<semaphore_mem>> -> memref<1x!tpu.dma_semaphore, #tpu.memory_space<semaphore_mem>>
    %50 = tpu.memref_squeeze %49 : memref<1x!tpu.dma_semaphore, #tpu.memory_space<semaphore_mem>> -> memref<!tpu.dma_semaphore, #tpu.memory_space<semaphore_mem>>
    tpu.wait_dma2 semaphore(%50 : memref<!tpu.dma_semaphore, #tpu.memory_space<semaphore_mem>>) src(%46 : memref<32x256xf32, #tpu.memory_space<vmem>>) dst(%48 : memref<32x256xf32, #tpu.memory_space<vmem>>)
    return
  }
  func.func @transform_0(%arg0: i32) -> (i32, i32, i32) {
    %c0_i32 = arith.constant 0 : i32
    %c0_i32_0 = arith.constant 0 : i32
    %c0_i32_1 = arith.constant 0 : i32
    return %arg0, %c0_i32, %c0_i32_0 : i32, i32, i32
  }
  func.func @transform_1(%arg0: i32) -> (i32, i32) {
    %c0_i32 = arith.constant 0 : i32
    %c0_i32_0 = arith.constant 0 : i32
    %c0_i32_1 = arith.constant 0 : i32
    return %c0_i32, %c0_i32_0 : i32, i32
  }
  func.func @transform_2(%arg0: i32) -> (i32, i32) {
    %c0_i32 = arith.constant 0 : i32
    %c0_i32_0 = arith.constant 0 : i32
    %c0_i32_1 = arith.constant 0 : i32
    return %c0_i32, %c0_i32_0 : i32, i32
  }
  func.func @transform_3(%arg0: i32) -> (i32, i32) {
    %c0_i32 = arith.constant 0 : i32
    %c0_i32_0 = arith.constant 0 : i32
    %c0_i32_1 = arith.constant 0 : i32
    return %c0_i32, %c0_i32_0 : i32, i32
  }
  func.func @transform_4(%arg0: i32) -> (i32, i32) {
    %c0_i32 = arith.constant 0 : i32
    %c0_i32_0 = arith.constant 0 : i32
    %c0_i32_1 = arith.constant 0 : i32
    return %c0_i32, %c0_i32_0 : i32, i32
  }
  func.func @transform_5(%arg0: i32) -> (i32, i32, i32) {
    %c0_i32 = arith.constant 0 : i32
    %c0_i32_0 = arith.constant 0 : i32
    %c0_i32_1 = arith.constant 0 : i32
    return %arg0, %c0_i32, %c0_i32_0 : i32, i32, i32
  }
}

</mosaic_0001>

<bundles_post_ra>
// kernel: tpu_custom_call.1
= control target key start
LH: loop header
LB: loop body
LE: loop exit
PB: predicated region body
PF: predicated region fallthrough
CT: control target
= control target key end

     0   :  { %10 = vsyncpa [#allocation4], 0  ;;  %s1471_s0 = inlined_call_operand.vmem [shape: f32[2,64,256], index: 0, kind: input, shape index: {}]   ;;  %s1472_s1 = inlined_call_operand.vmem [shape: f32[256,50], index: 1, kind: input, shape index: {}]   ;;  %s1473_s2 = inlined_call_operand.hbm [shape: f32[32,64], index: 2, kind: input, shape index: {}]   ;;  %s1474_s3 = inlined_call_operand.hbm [shape: f32[32,51], index: 3, kind: input, shape index: {}]   ;;  %s1475_s4 = inlined_call_operand.vmem [shape: f32[50,256], index: 4, kind: input, shape index: {}]   ;;  %s1476_s5 = inlined_call_operand.hbm [shape: f32[2,64,256], index: 5, kind: output, shape index: {}]  }
   0x1   :  { %11 = vsyncpa [#allocation7], 0 }
   0x2   :  { %12 = vsyncpa [#allocation5], 0  ;;  %s1098_s18 = smov [#allocation3]  }
   0x3   :  { %s22_s19 = sshll.u32 %s1098_s18, 4  ;;  %s23_s19 = int_to_ptr.vmem [resolvable:$true] %s22_s19 }
   0x4   :  { %s1036_s20 = scalar_lea.vmem %s23_s19, 512  ;;  %p1041_p1 = scmp.lt.s32.totalorder %s23_s19, %s23_s19 }
   0x5   :  { %p1037_p0 = scmp.ne.s32.totalorder %s23_s19, %s1036_s20  ;;  %p1042_p2 = scmp.lt.s32.totalorder %s1036_s20, %s1036_s20 }
   0x7   :  { %p1043_p3 = por %p1042_p2, %p1041_p1 }
   0x9   :  { %p1044_p4 = pnand %p1043_p3, %p1037_p0 }
   0xb   :  { %1047 = shalt.err (!%p1044_p4)
}
   0xc   :  { %s1099_s21 = smov 128   ;;  %s1100_s22 = smov 8  }
   0xd   :  { %28 = dma.hbm_to_vmem [thread:$0]  %s1473_s2, 512, %s23_s19, [#allocation4], %s1099_s21, %s1099_s21, %s1100_s22  }
   0xe   :  { %s1101_s25 = smov [#allocation6]  }
   0xf   :  { %s34_s26 = sshll.u32 %s1101_s25, 4  ;;  %s35_s26 = int_to_ptr.vmem [resolvable:$true] %s34_s26 }
  0x10   :  { %s1056_s27 = scalar_lea.vmem %s35_s26, 512  ;;  %p1061_p6 = scmp.lt.s32.totalorder %s35_s26, %s35_s26 }
  0x11   :  { %p1057_p5 = scmp.ne.s32.totalorder %s35_s26, %s1056_s27  ;;  %p1062_p7 = scmp.lt.s32.totalorder %s1056_s27, %s1056_s27 }
  0x13   :  { %p1063_p8 = por %p1062_p7, %p1061_p6 }
  0x15   :  { %p1064_p9 = pnand %p1063_p8, %p1057_p5 }
  0x17   :  { %1067 = shalt.err (!%p1064_p9)
}
  0x18   :  { %40 = dma.hbm_to_vmem [thread:$0]  %s1474_s3, 512, %s35_s26, [#allocation7], %s1099_s21, %s1099_s21, %s1100_s22  }
  0x19   :  { %1088 = dma.done.wait [#allocation4], 512  }
  0x1a   :  { %1089 = vsyncadd [#allocation4], 4294966784 }
  0x1b   :  { %1090 = dma.done.wait [#allocation7], 512  }
  0x1c   :  { %1091 = vsyncadd [#allocation7], 4294966784  ;;  %v831_v0 = vld [vmem:[%s1471_s0 + $0x40] sm:$0xff]  ;;  %v832_v1 = vld [vmem:[%s1471_s0 + $0x48] sm:$0xff] }
  0x1d   :  { %v833_v2 = vld [vmem:[%s1471_s0 + $0x50] sm:$0xff]  ;;  %84 = vst [vmem:[#allocation8] sm:$0xff] %v831_v0  ;;  %86 = vst [vmem:[#allocation8 + $0x8] sm:$0xff] %v832_v1  ;;  %v834_v3 = vld [vmem:[%s1471_s0 + $0x58] sm:$0xff] }
  0x1e   :  { %88 = vst [vmem:[#allocation8 + $0x10] sm:$0xff] %v833_v2  ;;  %v835_v4 = vld [vmem:[%s1471_s0 + $0x60] sm:$0xff]  ;;  %v836_v5 = vld [vmem:[%s1471_s0 + $0x68] sm:$0xff]  ;;  %90 = vst [vmem:[#allocation8 + $0x18] sm:$0xff] %v834_v3 }
  0x1f   :  { %92 = vst [vmem:[#allocation8 + $0x20] sm:$0xff] %v835_v4  ;;  %94 = vst [vmem:[#allocation8 + $0x28] sm:$0xff] %v836_v5  ;;  %v837_v6 = vld [vmem:[%s1471_s0 + $0x70] sm:$0xff]  ;;  %v838_v7 = vld [vmem:[%s1471_s0 + $0x78] sm:$0xff] }
  0x20   :  { %96 = vst [vmem:[#allocation8 + $0x30] sm:$0xff] %v837_v6  ;;  %98 = vst [vmem:[#allocation8 + $0x38] sm:$0xff] %v838_v7 }
  0x21   :  { %106 = vsyncadd [#allocation2], 1024  ;;  %v840_v8 = vld [vmem:[%s1471_s0 + $0xc0] sm:$0xff]  ;;  %v841_v9 = vld [vmem:[%s1471_s0 + $0xc8] sm:$0xff] }
  0x22   :  { %144 = vst [vmem:[#allocation8 + $0x80] sm:$0xff] %v840_v8  ;;  %146 = vst [vmem:[#allocation8 + $0x88] sm:$0xff] %v841_v9  ;;  %v842_v10 = vld [vmem:[%s1471_s0 + $0xd0] sm:$0xff]  ;;  %v843_v11 = vld [vmem:[%s1471_s0 + $0xd8] sm:$0xff] }
  0x23   :  { %v844_v12 = vld [vmem:[%s1471_s0 + $0xe0] sm:$0xff]  ;;  %148 = vst [vmem:[#allocation8 + $0x90] sm:$0xff] %v842_v10  ;;  %150 = vst [vmem:[#allocation8 + $0x98] sm:$0xff] %v843_v11  ;;  %v845_v13 = vld [vmem:[%s1471_s0 + $0xe8] sm:$0xff] }
  0x24   :  { %152 = vst [vmem:[#allocation8 + $0xa0] sm:$0xff] %v844_v12  ;;  %v846_v14 = vld [vmem:[%s1471_s0 + $0xf0] sm:$0xff]  ;;  %v847_v15 = vld [vmem:[%s1471_s0 + $0xf8] sm:$0xff]  ;;  %154 = vst [vmem:[#allocation8 + $0xa8] sm:$0xff] %v845_v13 }
  0x25   :  { %156 = vst [vmem:[#allocation8 + $0xb0] sm:$0xff] %v846_v14  ;;  %158 = vst [vmem:[#allocation8 + $0xb8] sm:$0xff] %v847_v15 }
  0x26   :  { %166 = vsyncadd [#allocation2 + $0x1], 1024  ;;  %v230_v16 = vld [vmem:[%s1472_s1 + $0xf8] sm:$0xff]  ;;  %v229_v18 = vld [vmem:[%s1472_s1 + $0xf0] sm:$0xff]  ;;  %vm404_vm0 = vcmask 523264   ;;  %vm642_vm1 = vcmask 1041408  }
  0x27   :  { %v214_v17 = vld [vmem:[%s1472_s1 + $0x78] sm:$0xff]  ;;  %869 = vmatprep.subr.mxu0 %v230_v16  ;;  %v213_v19 = vld [vmem:[%s1472_s1 + $0x70] sm:$0xff]  ;;  %v228_v20 = vld [vmem:[%s1472_s1 + $0xe8] sm:$0xff]  ;;  %vm617_vm2 = vcmask 408576  }
  0x28   :  { %870 = vmatpush3.msra.mxu0 %v214_v17  ;;  %v212_v21 = vld [vmem:[%s1472_s1 + $0x68] sm:$0xff]  ;;  %v227_v22 = vld [vmem:[%s1472_s1 + $0xe0] sm:$0xff]  ;;  %v226_v24 = vld [vmem:[%s1472_s1 + $0xd8] sm:$0xff] }
  0x29   :  { %871 = vmatprep.subr.mxu0 %v229_v18  ;;  %v211_v23 = vld [vmem:[%s1472_s1 + $0x60] sm:$0xff]  ;;  %v210_v25 = vld [vmem:[%s1472_s1 + $0x58] sm:$0xff]  ;;  %v225_v26 = vld [vmem:[%s1472_s1 + $0xd0] sm:$0xff] }
  0x2a   :  { %872 = vmatpush3.msra.mxu0 %v213_v19  ;;  %v209_v27 = vld [vmem:[%s1472_s1 + $0x50] sm:$0xff]  ;;  %v224_v28 = vld [vmem:[%s1472_s1 + $0xc8] sm:$0xff]  ;;  %v223_v31 = vld [vmem:[%s1472_s1 + $0xc0] sm:$0xff]  ;;  %v1102_v19 = vmov 50  }
  0x2b   :  { %873 = vmatprep.subr.mxu0 %v228_v20  ;;  %v208_v29 = vld [vmem:[%s1472_s1 + $0x48] sm:$0xff]  ;;  %v207_v32 = vld [vmem:[%s1472_s1 + $0x40] sm:$0xff]  ;;  %v222_v33 = vld [vmem:[%s1472_s1 + $0xb8] sm:$0xff]  ;;  %1026 = vset.pattern.permute.xlu0 %v1102_v19 }
  0x2c   :  { %874 = vmatpush3.msra.mxu0 %v212_v21  ;;  %v168_v30 = vld [vmem:[%s1471_s0 + $0x8] sm:$0xff]  ;;  %v206_v34 = vld [vmem:[%s1472_s1 + $0x38] sm:$0xff]  ;;  %v221_v35 = vld [vmem:[%s1472_s1 + $0xb0] sm:$0xff]  ;;  %1027 = vset.pattern.permute.xlu1 %v1102_v19 }
  0x2d   :  { %875 = vmatprep.subr.mxu0 %v227_v22  ;;  %295 = vmatprep.mubr.f32.mxu0 %v168_v30  ;;  %v205_v36 = vld [vmem:[%s1472_s1 + $0x30] sm:$0xff]  ;;  %v220_v37 = vld [vmem:[%s1472_s1 + $0xa8] sm:$0xff]  ;;  %v219_v39 = vld [vmem:[%s1472_s1 + $0xa0] sm:$0xff] }
  0x2e   :  { %876 = vmatpush3.msra.mxu0 %v211_v23  ;;  %v204_v38 = vld [vmem:[%s1472_s1 + $0x28] sm:$0xff]  ;;  %v203_v40 = vld [vmem:[%s1472_s1 + $0x20] sm:$0xff]  ;;  %v218_v41 = vld [vmem:[%s1472_s1 + $0x98] sm:$0xff] }
  0x2f   :  { %877 = vmatprep.subr.mxu0 %v226_v24  ;;  %v202_v42 = vld [vmem:[%s1472_s1 + $0x18] sm:$0xff]  ;;  %v217_v43 = vld [vmem:[%s1472_s1 + $0x90] sm:$0xff]  ;;  %v216_v45 = vld [vmem:[%s1472_s1 + $0x88] sm:$0xff] }
  0x30   :  { %878 = vmatpush3.msra.mxu0 %v210_v25  ;;  %v201_v44 = vld [vmem:[%s1472_s1 + $0x10] sm:$0xff]  ;;  %v200_v46 = vld [vmem:[%s1472_s1 + $0x8] sm:$0xff]  ;;  %v215_v47 = vld [vmem:[%s1472_s1 + $0x80] sm:$0xff] }
  0x31   :  { %879 = vmatprep.subr.mxu0 %v225_v26  ;;  %v199_v48 = vld [vmem:[%s1472_s1] sm:$0xff]  ;;  %v170_v50 = vld [vmem:[%s1471_s0 + $0x18] sm:$0xff]  ;;  %v169_v51 = vld [vmem:[%s1471_s0 + $0x10] sm:$0xff] }
  0x32   :  { %880 = vmatpush3.msra.mxu0 %v209_v27  ;;  %v167_v49 = vld [vmem:[%s1471_s0] sm:$0xff]  ;;  %v172_v52 = vld [vmem:[%s1471_s0 + $0x28] sm:$0xff]  ;;  %v174_v54 = vld [vmem:[%s1471_s0 + $0x38] sm:$0xff] }
  0x33   :  { %881 = vmatprep.subr.mxu0 %v224_v28  ;;  %v171_v53 = vld [vmem:[%s1471_s0 + $0x20] sm:$0xff]  ;;  %v173_v55 = vld [vmem:[%s1471_s0 + $0x30] sm:$0xff]  ;;  %v176_v56 = vld [vmem:[%s1471_s0 + $0x48] sm:$0xff] }
  0x34   :  { %882 = vmatpush3.msra.mxu0 %v208_v29  ;;  %v175_v57 = vld [vmem:[%s1471_s0 + $0x40] sm:$0xff]  ;;  %v178_v58 = vld [vmem:[%s1471_s0 + $0x58] sm:$0xff]  ;;  %v177_v59 = vld [vmem:[%s1471_s0 + $0x50] sm:$0xff] }
  0x35   :  { %883 = vmatprep.subr.mxu0 %v223_v31  ;;  %v180_v60 = vld [vmem:[%s1471_s0 + $0x68] sm:$0xff]  ;;  %v179_v61 = vld [vmem:[%s1471_s0 + $0x60] sm:$0xff]  ;;  %v182_v62 = vld [vmem:[%s1471_s0 + $0x78] sm:$0xff] }
  0x36   :  { %884 = vmatpush3.msra.mxu0 %v207_v32  ;;  %v181_v63 = vld [vmem:[%s1471_s0 + $0x70] sm:$0xff]  ;;  %v184_v0 = vld [vmem:[%s1471_s0 + $0x88] sm:$0xff]  ;;  %v183_v1 = vld [vmem:[%s1471_s0 + $0x80] sm:$0xff] }
  0x37   :  { %885 = vmatprep.subr.mxu0 %v222_v33  ;;  %v186_v2 = vld [vmem:[%s1471_s0 + $0x98] sm:$0xff]  ;;  %v185_v3 = vld [vmem:[%s1471_s0 + $0x90] sm:$0xff]  ;;  %v188_v4 = vld [vmem:[%s1471_s0 + $0xa8] sm:$0xff] }
  0x38   :  { %886 = vmatpush3.msra.mxu0 %v206_v34  ;;  %v187_v5 = vld [vmem:[%s1471_s0 + $0xa0] sm:$0xff]  ;;  %v190_v6 = vld [vmem:[%s1471_s0 + $0xb8] sm:$0xff]  ;;  %v189_v7 = vld [vmem:[%s1471_s0 + $0xb0] sm:$0xff] }
  0x39   :  { %887 = vmatprep.subr.mxu0 %v221_v35  ;;  %v192_v8 = vld [vmem:[%s1471_s0 + $0xc8] sm:$0xff]  ;;  %v191_v9 = vld [vmem:[%s1471_s0 + $0xc0] sm:$0xff]  ;;  %v194_v10 = vld [vmem:[%s1471_s0 + $0xd8] sm:$0xff] }
  0x3a   :  { %888 = vmatpush3.msra.mxu0 %v205_v36  ;;  %v193_v11 = vld [vmem:[%s1471_s0 + $0xd0] sm:$0xff]  ;;  %v196_v12 = vld [vmem:[%s1471_s0 + $0xe8] sm:$0xff]  ;;  %v195_v13 = vld [vmem:[%s1471_s0 + $0xe0] sm:$0xff] }
  0x3b   :  { %889 = vmatprep.subr.mxu0 %v220_v37  ;;  %v198_v14 = vld [vmem:[%s1471_s0 + $0xf8] sm:$0xff]  ;;  %v197_v15 = vld [vmem:[%s1471_s0 + $0xf0] sm:$0xff]  ;;  %v1383_v16 = vld [vmem:[#allocation3] sm:$0xff] }
  0x3c   :  { %890 = vmatpush3.msra.mxu0 %v204_v38  ;;  %989 = vmatprep.mubr.msk.f32.mxu1 %vm404_vm0, %v1383_v16  ;;  %v1387_v17 = vld [vmem:[#allocation6] sm:$0xff]  ;;  %v1389_v18 = vld [vmem:[#allocation6 + $0x10] sm:$0xff]  ;;  %v1393_v20 = vld [vmem:[#allocation6 + $0x8] sm:$0xff] }
  0x3d   :  { %891 = vmatprep.subr.mxu0 %v219_v39  ;;  %386 = vperm.xlu0 %1026, %v1387_v17   ;;  %v1395_v21 = vld [vmem:[#allocation6 + $0x18] sm:$0xff]  ;;  %v608_v19 = vld [vmem:[%s1475_s4 + $0x28] sm:$0xff] }
  0x3e   :  { %892 = vmatpush3.msra.mxu0 %v203_v40  ;;  %396 = vperm.xlu1 %1027, %v1389_v18  }
  0x3f   :  { %893 = vmatprep.subr.mxu0 %v218_v41 }
  0x40   :  { %894 = vmatpush3.msra.mxu0 %v202_v42 }
  0x41   :  { %895 = vmatprep.subr.mxu0 %v217_v43  ;;  %391 = vperm.xlu0 %1026, %v1393_v20  }
  0x42   :  { %896 = vmatpush3.msra.mxu0 %v201_v44  ;;  %401 = vperm.xlu1 %1027, %v1395_v21  }
  0x43   :  { %897 = vmatprep.subr.mxu0 %v216_v45 }
  0x44   :  { %898 = vmatpush3.msra.mxu0 %v200_v46 }
  0x45   :  { %899 = vmatprep.subr.mxu0 %v215_v47 }
  0x46   :  { %900 = vmatpush3.msra.mxu0 %v199_v48 }
  0x47   :  { %296 = vmatmul.mubr.f32.vlgmr.msra.gmra.mxu0 %v167_v49 }
  0x48   :  { %300 = vmatprep.mubr.f32.mxu0 %v170_v50 }
  0x4b   :  { %301 = vmatmul.mubr.f32.gmra.mxu0 %v169_v51 }
  0x4c   :  { %305 = vmatprep.mubr.f32.mxu0 %v172_v52 }
  0x4f   :  { %306 = vmatmul.mubr.f32.gmra.mxu0 %v171_v53 }
  0x50   :  { %310 = vmatprep.mubr.f32.mxu0 %v174_v54  ;;  %v377_v54 = vld [vmem:[#allocation3 + $0x8] sm:$0xff] }
  0x53   :  { %311 = vmatmul.mubr.f32.gmra.mxu0 %v173_v55  ;;  %v378_v55 = vld [vmem:[#allocation3 + $0x10] sm:$0xff] }
  0x54   :  { %315 = vmatprep.mubr.f32.mxu0 %v176_v56 }
  0x57   :  { %316 = vmatmul.mubr.f32.gmra.mxu0 %v175_v57 }
  0x58   :  { %320 = vmatprep.mubr.f32.mxu0 %v178_v58  ;;  %v379_v58 = vld [vmem:[#allocation3 + $0x18] sm:$0xff] }
  0x5b   :  { %321 = vmatmul.mubr.f32.gmra.mxu0 %v177_v59 }
  0x5c   :  { %325 = vmatprep.mubr.f32.mxu0 %v180_v60 }
  0x5f   :  { %326 = vmatmul.mubr.f32.gmra.mxu0 %v179_v61 }
  0x60   :  { %330 = vmatprep.mubr.f32.mxu0 %v182_v62 }
  0x63   :  { %331 = vmatmul.mubr.f32.gmra.mxu0 %v181_v63 }
  0x64   :  { %335 = vmatprep.mubr.f32.mxu0 %v184_v0 }
  0x67   :  { %336 = vmatmul.mubr.f32.gmra.mxu0 %v183_v1 }
  0x68   :  { %340 = vmatprep.mubr.f32.mxu0 %v186_v2 }
  0x6b   :  { %341 = vmatmul.mubr.f32.gmra.mxu0 %v185_v3 }
  0x6c   :  { %345 = vmatprep.mubr.f32.mxu0 %v188_v4 }
  0x6f   :  { %346 = vmatmul.mubr.f32.gmra.mxu0 %v187_v5 }
  0x70   :  { %350 = vmatprep.mubr.f32.mxu0 %v190_v6 }
  0x73   :  { %351 = vmatmul.mubr.f32.gmra.mxu0 %v189_v7 }
  0x74   :  { %355 = vmatprep.mubr.f32.mxu0 %v192_v8 }
  0x77   :  { %356 = vmatmul.mubr.f32.gmra.mxu0 %v191_v9  ;;  %v616_v9 = vld [vmem:[%s1475_s4 + $0x68] sm:$0x3] }
  0x78   :  { %360 = vmatprep.mubr.f32.mxu0 %v194_v10  ;;  %v615_v10 = vld [vmem:[%s1475_s4 + $0x60] sm:$0x3] }
  0x7b   :  { %361 = vmatmul.mubr.f32.gmra.mxu0 %v193_v11  ;;  %v614_v11 = vld [vmem:[%s1475_s4 + $0x58] sm:$0xff] }
  0x7c   :  { %365 = vmatprep.mubr.f32.mxu0 %v196_v12  ;;  %v613_v12 = vld [vmem:[%s1475_s4 + $0x50] sm:$0xff] }
  0x7f   :  { %366 = vmatmul.mubr.f32.gmra.mxu0 %v195_v13  ;;  %v612_v13 = vld [vmem:[%s1475_s4 + $0x48] sm:$0xff] }
  0x80   :  { %370 = vmatprep.mubr.f32.mxu0 %v198_v14  ;;  %v611_v14 = vld [vmem:[%s1475_s4 + $0x40] sm:$0xff] }
  0x83   :  { %371 = vmatmul.mubr.f32.gmra.mxu0 %v197_v15  ;;  %v610_v15 = vld [vmem:[%s1475_s4 + $0x38] sm:$0xff] }
 0x107   :  { %v901_v22 = vpop.f32.mrf.mxu0 }
 0x109   :  { %v902_v23 = vpop.f32.mrf.mxu0 }
 0x10a   :  { %v903_v52 = vadd.f32 %v902_v23, %v901_v22  ;;  %v607_v22 = vld [vmem:[%s1475_s4 + $0x20] sm:$0xff]  ;;  %v606_v23 = vld [vmem:[%s1475_s4 + $0x18] sm:$0xff] }
 0x10b   :  { %v904_v24 = vpop.f32.mrf.mxu0 }
 0x10d   :  { %v905_v25 = vpop.f32.mrf.mxu0 }
 0x10e   :  { %v906_v50 = vadd.f32 %v905_v25, %v904_v24  ;;  %v1103_v24 = vmov 0.0   ;;  %v605_v25 = vld [vmem:[%s1475_s4 + $0x10] sm:$0xff] }
 0x10f   :  { %v907_v26 = vpop.f32.mrf.mxu0 }
 0x111   :  { %v908_v27 = vpop.f32.mrf.mxu0 }
 0x112   :  { %v909_v48 = vadd.f32 %v908_v27, %v907_v26  ;;  %v604_v26 = vld [vmem:[%s1475_s4 + $0x8] sm:$0xff]  ;;  %v603_v27 = vld [vmem:[%s1475_s4] sm:$0xff] }
 0x113   :  { %v910_v28 = vpop.f32.mrf.mxu0 }
 0x115   :  { %v911_v29 = vpop.f32.mrf.mxu0 }
 0x116   :  { %v912_v46 = vadd.f32 %v911_v29, %v910_v28  ;;  %v387_v28 = vpop.permute.xlu0 %386 }
 0x117   :  { %v913_v30 = vpop.f32.mrf.mxu0 }
 0x119   :  { %v914_v31 = vpop.f32.mrf.mxu0 }
 0x11a   :  { %v915_v44 = vadd.f32 %v914_v31, %v913_v30  ;;  %v392_v29 = vpop.permute.xlu0 %391  ;;  %v397_v31 = vpop.permute.xlu1 %396 }
 0x11b   :  { %v916_v32 = vpop.f32.mrf.mxu0 }
 0x11d   :  { %v917_v33 = vpop.f32.mrf.mxu0 }
 0x11e   :  { %v918_v42 = vadd.f32 %v917_v33, %v916_v32 }
 0x11f   :  { %v919_v34 = vpop.f32.mrf.mxu0 }
 0x121   :  { %v920_v35 = vpop.f32.mrf.mxu0 }
 0x122   :  { %v921_v40 = vadd.f32 %v920_v35, %v919_v34 }
 0x123   :  { %v922_v36 = vpop.f32.mrf.mxu0 }
 0x125   :  { %v923_v37 = vpop.f32.mrf.mxu0 }
 0x126   :  { %v924_v38 = vadd.f32 %v923_v37, %v922_v36 }
 0x127   :  { %v1399_v39 = vpop.f32.mrf.mxu0 }
 0x128   :  { %973 = vmatprep.subr.mxu1 %v924_v38 }
 0x129   :  { %v926_v41 = vpop.f32.mrf.mxu0  ;;  %974 = vmatpush3.msra.mxu1 %v924_v38 }
 0x12a   :  { %975 = vmatprep.subr.mxu1 %v921_v40  ;;  %v927_v8 = vadd.f32 %v926_v41, %v1399_v39  ;;  %v402_v39 = vpop.permute.xlu1 %401 }
 0x12b   :  { %v928_v43 = vpop.f32.mrf.mxu0  ;;  %976 = vmatpush3.msra.mxu1 %v921_v40 }
 0x12c   :  { %977 = vmatprep.subr.mxu1 %v918_v42 }
 0x12d   :  { %v929_v45 = vpop.f32.mrf.mxu0  ;;  %978 = vmatpush3.msra.mxu1 %v918_v42 }
 0x12e   :  { %979 = vmatprep.subr.mxu1 %v915_v44  ;;  %v930_v7 = vadd.f32 %v929_v45, %v928_v43 }
 0x12f   :  { %v931_v47 = vpop.f32.mrf.mxu0  ;;  %980 = vmatpush3.msra.mxu1 %v915_v44 }
 0x130   :  { %981 = vmatprep.subr.mxu1 %v912_v46 }
 0x131   :  { %v932_v49 = vpop.f32.mrf.mxu0  ;;  %982 = vmatpush3.msra.mxu1 %v912_v46 }
 0x132   :  { %983 = vmatprep.subr.mxu1 %v909_v48  ;;  %v933_v6 = vadd.f32 %v932_v49, %v931_v47 }
 0x133   :  { %v934_v51 = vpop.f32.mrf.mxu0  ;;  %984 = vmatpush3.msra.mxu1 %v909_v48 }
 0x134   :  { %985 = vmatprep.subr.mxu1 %v906_v50 }
 0x135   :  { %v935_v53 = vpop.f32.mrf.mxu0  ;;  %986 = vmatpush3.msra.mxu1 %v906_v50 }
 0x136   :  { %987 = vmatprep.subr.mxu1 %v903_v52  ;;  %v936_v5 = vadd.f32 %v935_v53, %v934_v51 }
 0x137   :  { %v937_v56 = vpop.f32.mrf.mxu0  ;;  %988 = vmatpush3.msra.mxu1 %v903_v52 }
 0x138   :  { %990 = vmatmul.mubr.msk.f32.vlgmr.msra.gmra.mxu1 %vm404_vm0, %v377_v54 }
 0x139   :  { %v938_v57 = vpop.f32.mrf.mxu0  ;;  %992 = vmatprep.mubr.msk.f32.mxu1 %vm404_vm0, %v378_v55 }
 0x13a   :  { %v939_v4 = vadd.f32 %v938_v57, %v937_v56 }
 0x13b   :  { %v940_v59 = vpop.f32.mrf.mxu0 }
 0x13c   :  { %993 = vmatmul.mubr.msk.f32.gmra.mxu1 %vm404_vm0, %v379_v58 }
 0x13d   :  { %v941_v60 = vpop.f32.mrf.mxu0  ;;  %1011 = vmatprep.mubr.msk.f32.mxu1 %vm404_vm0, %v1383_v16  ;;  %v609_v16 = vld [vmem:[%s1475_s4 + $0x30] sm:$0xff] }
 0x13e   :  { %v942_v3 = vadd.f32 %v941_v60, %v940_v59 }
 0x13f   :  { %v943_v61 = vpop.f32.mrf.mxu0 }
 0x141   :  { %v944_v62 = vpop.f32.mrf.mxu0 }
 0x142   :  { %v945_v2 = vadd.f32 %v944_v62, %v943_v61 }
 0x143   :  { %v946_v63 = vpop.f32.mrf.mxu0 }
 0x145   :  { %v947_v0 = vpop.f32.mrf.mxu0 }
 0x146   :  { %v948_v1 = vadd.f32 %v947_v0, %v946_v63 }
 0x148   :  { %995 = vmatprep.subr.mxu1 %v948_v1 }
 0x149   :  { %996 = vmatpush3.msra.mxu1 %v948_v1 }
 0x14a   :  { %997 = vmatprep.subr.mxu1 %v945_v2 }
 0x14b   :  { %998 = vmatpush3.msra.mxu1 %v945_v2 }
 0x14c   :  { %999 = vmatprep.subr.mxu1 %v942_v3 }
 0x14d   :  { %1000 = vmatpush3.msra.mxu1 %v942_v3 }
 0x14e   :  { %1001 = vmatprep.subr.mxu1 %v939_v4 }
 0x14f   :  { %1002 = vmatpush3.msra.mxu1 %v939_v4 }
 0x150   :  { %1003 = vmatprep.subr.mxu1 %v936_v5 }
 0x151   :  { %1004 = vmatpush3.msra.mxu1 %v936_v5 }
 0x152   :  { %1005 = vmatprep.subr.mxu1 %v933_v6 }
 0x153   :  { %1006 = vmatpush3.msra.mxu1 %v933_v6 }
 0x154   :  { %1007 = vmatprep.subr.mxu1 %v930_v7 }
 0x155   :  { %1008 = vmatpush3.msra.mxu1 %v930_v7 }
 0x156   :  { %1009 = vmatprep.subr.mxu1 %v927_v8 }
 0x157   :  { %1010 = vmatpush3.msra.mxu1 %v927_v8 }
 0x158   :  { %1012 = vmatmul.mubr.msk.f32.vlgmr.msra.gmra.mxu1 %vm404_vm0, %v377_v54  ;;  %857 = vmatprep.subr.msk.mxu1 %vm642_vm1, %v616_v9 }
 0x159   :  { %1014 = vmatprep.mubr.msk.f32.mxu1 %vm404_vm0, %v378_v55  ;;  %858 = vmatpush1.msk.msra.mxu1 %vm642_vm1, %v615_v10 }
 0x15a   :  { %669 = vmatprep.subr.mxu1 %v614_v11 }
 0x15b   :  { %670 = vmatpush1.msra.mxu1 %v613_v12 }
 0x15c   :  { %1015 = vmatmul.mubr.msk.f32.gmra.mxu1 %vm404_vm0, %v379_v58  ;;  %671 = vmatprep.subr.mxu1 %v612_v13 }
 0x15d   :  { %672 = vmatpush1.msra.mxu1 %v611_v14  ;;  %713 = vmatprep.mubr.f32.mxu1 %v1103_v24 }
 0x15e   :  { %673 = vmatprep.subr.mxu1 %v610_v15 }
 0x15f   :  { %674 = vmatpush1.msra.mxu1 %v609_v16 }
 0x160   :  { %675 = vmatprep.subr.mxu1 %v608_v19 }
 0x161   :  { %676 = vmatpush1.msra.mxu1 %v607_v22 }
 0x162   :  { %677 = vmatprep.subr.mxu1 %v606_v23 }
 0x163   :  { %678 = vmatpush1.msra.mxu1 %v605_v25 }
 0x164   :  { %679 = vmatprep.subr.mxu1 %v604_v26 }
 0x165   :  { %680 = vmatpush1.msra.mxu1 %v603_v27 }
 0x1f8   :  { %v991_v30 = vpop.f32.mrf.mxu1 }
 0x1f9   :  { %v489_v32 = vadd.f32 %v991_v30, %v392_v29 }
 0x1fa   :  { %v483_v33 = vpop.f32.mrf.mxu1 }
 0x1fb   :  { %v484_v34 = vadd.f32 %v483_v33, %v387_v28  ;;  %v503_v37 = vmax.f32 %v489_v32, 0.0 }
 0x1fc   :  { %v994_v35 = vpop.f32.mrf.mxu1 }
 0x1fd   :  { %v502_v36 = vmax.f32 %v484_v34, 0.0  ;;  %v507_v42 = vmul.f32 %v503_v37, %v1393_v20  ;;  %v499_v44 = vadd.f32 %v994_v35, %v402_v39 }
 0x1fe   :  { %v493_v38 = vpop.f32.mrf.mxu1 }
 0x1ff   :  { %v506_v40 = vmul.f32 %v502_v36, %v1387_v17  ;;  %v494_v41 = vadd.f32 %v493_v38, %v397_v31  ;;  %v505_v46 = vmax.f32 %v499_v44, 0.0 }
 0x201   :  { %859 = vmatmul.mubr.msk.f32.vlgmr.msra.gmra.mxu1 %vm617_vm2, %v506_v40  ;;  %v504_v43 = vmax.f32 %v494_v41, 0.0  ;;  %v509_v47 = vmul.f32 %v505_v46, %v1395_v21 }
 0x202   :  { %719 = vmatprep.mubr.f32.mxu1 %v1103_v24 }
 0x203   :  { %v508_v45 = vmul.f32 %v504_v43, %v1389_v18 }
 0x205   :  { %860 = vmatmul.mubr.msk.f32.gmra.mxu1 %vm617_vm2, %v507_v42 }
 0x206   :  { %725 = vmatprep.mubr.f32.mxu1 %v1103_v24 }
 0x209   :  { %861 = vmatmul.mubr.msk.f32.gmra.mxu1 %vm617_vm2, %v508_v45 }
 0x20a   :  { %731 = vmatprep.mubr.f32.mxu1 %v1103_v24 }
 0x20d   :  { %862 = vmatmul.mubr.msk.f32.gmra.mxu1 %vm617_vm2, %v509_v47 }
 0x20e   :  { %737 = vmatprep.mubr.f32.mxu1 %v1103_v24 }
 0x218   :  { %v1013_v48 = vpop.f32.mrf.mxu1 }
 0x219   :  { %v582_v50 = vadd.f32 %v1013_v48, %v392_v29 }
 0x21a   :  { %v576_v49 = vpop.f32.mrf.mxu1 }
 0x21b   :  { %v577_v51 = vadd.f32 %v576_v49, %v387_v28  ;;  %v596_v55 = vmax.f32 %v582_v50, 0.0 }
 0x21c   :  { %v1016_v52 = vpop.f32.mrf.mxu1 }
 0x21d   :  { %v595_v53 = vmax.f32 %v577_v51, 0.0  ;;  %v600_v58 = vmul.f32 %v596_v55, %v1393_v20  ;;  %v592_v59 = vadd.f32 %v1016_v52, %v402_v39 }
 0x21e   :  { %v586_v54 = vpop.f32.mrf.mxu1 }
 0x21f   :  { %v599_v56 = vmul.f32 %v595_v53, %v1387_v17  ;;  %v587_v57 = vadd.f32 %v586_v54, %v397_v31  ;;  %v598_v61 = vmax.f32 %v592_v59, 0.0 }
 0x221   :  { %863 = vmatmul.mubr.msk.f32.gmra.mxu1 %vm617_vm2, %v599_v56  ;;  %v597_v60 = vmax.f32 %v587_v57, 0.0  ;;  %v602_v63 = vmul.f32 %v598_v61, %v1395_v21 }
 0x222   :  { %743 = vmatprep.mubr.f32.mxu1 %v1103_v24 }
 0x223   :  { %v601_v62 = vmul.f32 %v597_v60, %v1389_v18 }
 0x225   :  { %864 = vmatmul.mubr.msk.f32.gmra.mxu1 %vm617_vm2, %v600_v58 }
 0x226   :  { %749 = vmatprep.mubr.f32.mxu1 %v1103_v24 }
 0x229   :  { %865 = vmatmul.mubr.msk.f32.gmra.mxu1 %vm617_vm2, %v601_v62 }
 0x22a   :  { %755 = vmatprep.mubr.f32.mxu1 %v1103_v24 }
 0x22d   :  { %866 = vmatmul.mubr.msk.f32.gmra.mxu1 %vm617_vm2, %v602_v63 }
 0x2c1   :  { %v715_v17 = vpop.f32.mrf.mxu1 }
 0x2c2   :  { %762 = vst [vmem:[#allocation8 + $0x40] sm:$0xff] %v715_v17 }
 0x2c3   :  { %v717_v0 = vpop.f32.mrf.mxu1 }
 0x2c4   :  { %763 = vst [vmem:[#allocation8 + $0x48] sm:$0xff] %v717_v0 }
 0x2c5   :  { %v721_v20 = vpop.f32.mrf.mxu1 }
 0x2c6   :  { %764 = vst [vmem:[#allocation8 + $0x50] sm:$0xff] %v721_v20 }
 0x2c7   :  { %v723_v1 = vpop.f32.mrf.mxu1 }
 0x2c8   :  { %765 = vst [vmem:[#allocation8 + $0x58] sm:$0xff] %v723_v1 }
 0x2c9   :  { %v727_v2 = vpop.f32.mrf.mxu1 }
 0x2ca   :  { %766 = vst [vmem:[#allocation8 + $0x60] sm:$0xff] %v727_v2 }
 0x2cb   :  { %v729_v3 = vpop.f32.mrf.mxu1 }
 0x2cc   :  { %767 = vst [vmem:[#allocation8 + $0x68] sm:$0xff] %v729_v3 }
 0x2cd   :  { %v733_v18 = vpop.f32.mrf.mxu1 }
 0x2ce   :  { %768 = vst [vmem:[#allocation8 + $0x70] sm:$0xff] %v733_v18 }
 0x2cf   :  { %v735_v4 = vpop.f32.mrf.mxu1 }
 0x2d0   :  { %769 = vst [vmem:[#allocation8 + $0x78] sm:$0xff] %v735_v4 }
 0x2e1   :  { %v739_v5 = vpop.f32.mrf.mxu1 }
 0x2e2   :  { %770 = vst [vmem:[#allocation8 + $0xc0] sm:$0xff] %v739_v5 }
 0x2e3   :  { %v741_v21 = vpop.f32.mrf.mxu1 }
 0x2e4   :  { %771 = vst [vmem:[#allocation8 + $0xc8] sm:$0xff] %v741_v21 }
 0x2e5   :  { %v745_v6 = vpop.f32.mrf.mxu1 }
 0x2e6   :  { %772 = vst [vmem:[#allocation8 + $0xd0] sm:$0xff] %v745_v6 }
 0x2e7   :  { %v747_v7 = vpop.f32.mrf.mxu1 }
 0x2e8   :  { %773 = vst [vmem:[#allocation8 + $0xd8] sm:$0xff] %v747_v7 }
 0x2e9   :  { %v751_v8 = vpop.f32.mrf.mxu1 }
 0x2ea   :  { %774 = vst [vmem:[#allocation8 + $0xe0] sm:$0xff] %v751_v8 }
 0x2eb   :  { %v753_v9 = vpop.f32.mrf.mxu1 }
 0x2ec   :  { %775 = vst [vmem:[#allocation8 + $0xe8] sm:$0xff] %v753_v9 }
 0x2ed   :  { %v757_v10 = vpop.f32.mrf.mxu1 }
 0x2ee   :  { %776 = vst [vmem:[#allocation8 + $0xf0] sm:$0xff] %v757_v10 }
 0x2ef   :  { %v759_v11 = vpop.f32.mrf.mxu1 }
 0x2f0   :  { %777 = vst [vmem:[#allocation8 + $0xf8] sm:$0xff] %v759_v11 }
 0x2f1   :  { %1092 = dma.done.wait [#allocation2], 1024 }
 0x2f2   :  { %1093 = vsyncadd [#allocation2], 4294966272 }
 0x2f3   :  { %1094 = dma.done.wait [#allocation2 + $0x1], 1024 }
 0x2f4   :  { %1095 = vsyncadd [#allocation2 + $0x1], 4294966272  ;;  %s1104_s4 = smov [#allocation8]  }
 0x2f5   :  { %s789_s25 = sshll.u32 %s1104_s4, 4  ;;  %s790_s25 = int_to_ptr.vmem [resolvable:$true] %s789_s25 }
 0x2f6   :  { %s1068_s0 = scalar_lea.vmem %s790_s25, 4096  ;;  %p1073_p11 = scmp.lt.s32.totalorder %s790_s25, %s790_s25 }
 0x2f7   :  { %p1069_p10 = scmp.ne.s32.totalorder %s790_s25, %s1068_s0  ;;  %p1074_p12 = scmp.lt.s32.totalorder %s1068_s0, %s1068_s0 }
 0x2f9   :  { %p1075_p13 = por %p1074_p12, %p1073_p11 }
 0x2fb   :  { %p1076_p0 = pnand %p1075_p13, %p1069_p10 }
 0x2fd   :  { %1079 = shalt.err (!%p1076_p0)
}
 0x2fe   :  { %s1105_s26 = smov 256   ;;  %s1106_s27 = smov 16  }
 0x2ff   :  { %795 = dma.vmem_to_hbm [thread:$0]  %s790_s25, 4096, %s1476_s5, [#allocation5], %s1105_s26, %s1105_s26, %s1106_s27  }
 0x300   :  { %1096 = dma.done.wait [#allocation5], 4096  }
 0x301   :  { %1097 = vsyncadd [#allocation5], 4294963200 }
 0x302   :  { %799 = vsyncpa [#allocation4], 1 }
 0x303   :  { %800 = vsyncpa [#allocation7], 1 }
 0x304   :  { %801 = vsyncpa [#allocation5], 1 }
 0x305   :  { %802 = vsyncmov [#allocation2] }
 0x308   :  { %s803_s29 = vpop.sfrf %802 }
 0x309   :  { %p867_p1 = scmp.ne.s32.totalorder %s803_s29, 0 }
 0x30b   :  { %807 = shalt.err (%p867_p1)  }
 0x30c   :  { %809 = vsyncmov [#allocation2 + $0x1] }
 0x30f   :  { %s810_s30 = vpop.sfrf %809 }
 0x310   :  { %p868_p2 = scmp.ne.s32.totalorder %s810_s30, 0 }
 0x312   :  { %814 = shalt.err (%p868_p2)  }

</bundles_post_ra>
